<compile_context>
chip_gen: v7x
topology: tpu7x:2x2x1
jax: 0.10.0
libtpu: 0.0.40
codegen_flags: <defaults>
</compile_context>

<pallas_src>
import numpy as np
import jax
import jax.numpy as jnp
from jax.experimental import pallas as pl
from jax.experimental.pallas import tpu as pltpu

PAD_CONST = -11.5129251  # unused in forward (kept for parity with the torch module)
LANE = 128


def _round_up(x, m):
    return ((x + m - 1) // m) * m


# ----------------------------------------------------------------------------
# Deterministic parameter construction (librosa slaney mel filterbank + hann)
# ----------------------------------------------------------------------------
def _hz_to_mel(freqs):
    freqs = np.atleast_1d(np.asarray(freqs, dtype=np.float64))
    f_sp = 200.0 / 3.0
    mels = freqs / f_sp
    min_log_hz = 1000.0
    min_log_mel = min_log_hz / f_sp
    logstep = np.log(6.4) / 27.0
    log_t = freqs >= min_log_hz
    mels[log_t] = min_log_mel + np.log(freqs[log_t] / min_log_hz) / logstep
    return mels


def _mel_to_hz(mels):
    mels = np.atleast_1d(np.asarray(mels, dtype=np.float64))
    f_sp = 200.0 / 3.0
    freqs = f_sp * mels
    min_log_hz = 1000.0
    min_log_mel = min_log_hz / f_sp
    logstep = np.log(6.4) / 27.0
    log_t = mels >= min_log_mel
    freqs[log_t] = min_log_hz * np.exp(logstep * (mels[log_t] - min_log_mel))
    return freqs


def mel_filterbank(sr, n_fft, n_mels, fmin, fmax):
    """librosa.filters.mel(...) equivalent (slaney scale, slaney norm)."""
    n_freqs = n_fft // 2 + 1
    fftfreqs = np.linspace(0.0, sr / 2.0, n_freqs)
    mel_pts = np.linspace(_hz_to_mel(fmin)[0], _hz_to_mel(fmax)[0], n_mels + 2)
    hz_pts = _mel_to_hz(mel_pts)
    fdiff = np.diff(hz_pts)
    ramps = hz_pts[:, None] - fftfreqs[None, :]
    weights = np.zeros((n_mels, n_freqs), dtype=np.float64)
    for i in range(n_mels):
        lower = -ramps[i] / fdiff[i]
        upper = ramps[i + 2] / fdiff[i + 1]
        weights[i] = np.maximum(0.0, np.minimum(lower, upper))
    enorm = 2.0 / (hz_pts[2: n_mels + 2] - hz_pts[:n_mels])
    weights *= enorm[:, None]
    return weights.astype(np.float32)  # (n_mels, n_freqs)


def hann_window_periodic(win_length):
    n = np.arange(win_length, dtype=np.float64)
    return 0.5 * (1.0 - np.cos(2.0 * np.pi * n / win_length))


def fused_dft_basis(n_fft, win_length, n_freqs_pad):
    """Real-DFT basis with the hann window folded in, cos|sin fused along
    columns and zero-padded to lane-aligned width: (n_fft, 2*n_freqs_pad) f32."""
    n_freqs = n_fft // 2 + 1
    win = hann_window_periodic(win_length)
    if win_length < n_fft:  # torch centers the window inside the n_fft frame
        pad_l = (n_fft - win_length) // 2
        w = np.zeros(n_fft, dtype=np.float64)
        w[pad_l: pad_l + win_length] = win
    else:
        w = win
    n = np.arange(n_fft, dtype=np.float64)[:, None]
    k = np.arange(n_freqs, dtype=np.float64)[None, :]
    ang = 2.0 * np.pi * n * k / n_fft
    basis = np.zeros((n_fft, 2 * n_freqs_pad), dtype=np.float32)
    basis[:, :n_freqs] = (w[:, None] * np.cos(ang)).astype(np.float32)
    basis[:, n_freqs_pad: n_freqs_pad + n_freqs] = (
        w[:, None] * np.sin(ang)).astype(np.float32)
    return basis


def fused_mel_fb(mel_weights, n_freqs_pad, n_mels_pad):
    """Zero-padded, duplicated mel filterbank so that
    re^2 @ fb + im^2 @ fb == (y*y) @ [fb; fb].   Shape: (2*n_freqs_pad, n_mels_pad)."""
    n_mels, n_freqs = mel_weights.shape
    fb = np.zeros((n_freqs_pad, n_mels_pad), dtype=np.float32)
    fb[:n_freqs, :n_mels] = mel_weights.T
    return np.concatenate([fb, fb], axis=0)


# ----------------------------------------------------------------------------
# Pallas kernel: windowed real-DFT -> power -> mel matmul -> clamp -> log
# ----------------------------------------------------------------------------
def melspec_kernel(frames_ref, basis_ref, fb2_ref, out_ref):
    x = frames_ref[...]                                                   # (T, n_fft) bf16
    # Fused re|im real-DFT (window folded into basis), f32 accumulation on MXU.
    y = jnp.dot(x, basis_ref[...], preferred_element_type=jnp.float32)    # (T, 2*F_pad) f32
    # Power spectrum + mel filterbank fused: (re^2 + im^2) @ fb == (y*y) @ [fb; fb]
    mel = jnp.dot(y * y, fb2_ref[...], preferred_element_type=jnp.float32)  # (T, M_pad) f32
    out_ref[...] = jnp.log(jnp.maximum(mel, 1e-5))


def melspec_pallas(frames, basis, fb2, row_tile=256):
    """frames: (R, n_fft) bf16; basis: (n_fft, 2*F_pad) bf16; fb2: (2*F_pad, M_pad) f32.
    Returns (R, M_pad) f32 log-mel (lane padding NOT yet stripped)."""
    R, n_fft = frames.shape
    two_f_pad, n_mels_pad = fb2.shape

    tile = min(row_tile, _round_up(R, 8))   # adaptive for tiny inputs; keeps 8-sublane alignment
    R_pad = _round_up(R, tile)
    if R_pad != R:
        frames = jnp.pad(frames, ((0, R_pad - R), (0, 0)))

    out = pl.pallas_call(
        melspec_kernel,
        out_shape=jax.ShapeDtypeStruct((R_pad, n_mels_pad), jnp.float32),
        grid=(R_pad // tile,),
        in_specs=[
            pl.BlockSpec((tile, n_fft), lambda i: (i, 0)),
            pl.BlockSpec((n_fft, two_f_pad), lambda i: (0, 0)),      # VMEM-resident constant
            pl.BlockSpec((two_f_pad, n_mels_pad), lambda i: (0, 0)),  # VMEM-resident constant
        ],
        out_specs=pl.BlockSpec((tile, n_mels_pad), lambda i: (i, 0)),
        compiler_params=pltpu.CompilerParams(
            dimension_semantics=("parallel",)),
    )(frames, basis, fb2)
    return out[:R]


# ----------------------------------------------------------------------------
# Module-equivalent wrapper
# ----------------------------------------------------------------------------
class MelSpectrogramJAX:
    def __init__(self, config, normalize=False, row_tile=256):
        self.sample_rate = config["sample_rate"]
        self.normalize = normalize
        self.pad_value = config.get("pad_value", PAD_CONST)
        self.n_fft = config["n_fft"]
        self.win_length = config.get("win_length", self.n_fft)
        self.hop_length = config.get("hop_length", self.win_length // 2)
        self.n_mels = config["n_mels"]
        self.f_min = config["f_min"]
        self.f_max = config["f_max"]
        self.row_tile = row_tile

        n_freqs = self.n_fft // 2 + 1
        self.n_freqs_pad = _round_up(n_freqs, LANE)   # lane-align freq dim
        self.n_mels_pad = _round_up(self.n_mels, LANE)  # lane-dense output stores

        mel_w = mel_filterbank(self.sample_rate, self.n_fft, self.n_mels,
                               self.f_min, self.f_max)               # (n_mels, n_freqs)
        self.fb2 = jnp.asarray(
            fused_mel_fb(mel_w, self.n_freqs_pad, self.n_mels_pad))   # (2*F_pad, M_pad) f32
        # bf16 DFT basis (window folded in); f32 accumulation in the kernel.
        self.basis = jnp.asarray(
            fused_dft_basis(self.n_fft, self.win_length, self.n_freqs_pad)
        ).astype(jnp.bfloat16)                                        # (n_fft, 2*F_pad) bf16

    def __call__(self, audio):
        # audio: [B, L] float32
        audio = audio.astype(jnp.float32)
        if self.normalize:
            peak = jnp.max(jnp.abs(audio), axis=1, keepdims=True)
            audio = audio / peak
        # forward() reflect pad
        p1 = (self.win_length - self.hop_length) // 2
        audio = jnp.pad(audio, ((0, 0), (p1, p1)), mode="reflect")
        # torchaudio Spectrogram center=True reflect pad
        p2 = self.n_fft // 2
        audio = jnp.pad(audio, ((0, 0), (p2, p2)), mode="reflect")
        B, L2 = audio.shape
        n_frames = 1 + (L2 - self.n_fft) // self.hop_length

        # TODO(synk): framing could be pulled inside the kernel (overlapping
        # element-offset blocks / manual DMA + in-VMEM assembly) to eliminate the
        # expanded frames round-trip through HBM; kept as a bf16 JAX gather here
        # for lowering robustness (bf16 already halves the gathered traffic).
        idx = (jnp.arange(n_frames)[:, None] * self.hop_length
               + jnp.arange(self.n_fft)[None, :])                     # (T, n_fft)
        frames = audio.astype(jnp.bfloat16)[:, idx]                   # (B, T, n_fft) bf16
        frames = frames.reshape(B * n_frames, self.n_fft)             # (R, n_fft)

        mel = melspec_pallas(frames, self.basis, self.fb2, self.row_tile)  # (R, M_pad)
        mel = mel[:, : self.n_mels]                                   # strip lane padding
        mel = mel.reshape(B, n_frames, self.n_mels)
        return jnp.transpose(mel, (0, 2, 1))                          # (B, n_mels, T)


if __name__ == "__main__":
    config = {
        "sample_rate": 16000,
        "n_fft": 256,
        "win_length": 256,
        "hop_length": 64,
        "n_mels": 32,
        "f_min": 0.0,
        "f_max": 8000.0,
    }
    mod = MelSpectrogramJAX(config, normalize=False)

    key = jax.random.PRNGKey(0)
    B, L = 2, 1024
    audio = jax.random.normal(key, (B, L), dtype=jnp.float32)

    out = mod(audio)
    out = jax.block_until_ready(out)
    expected_frames = 1 + (L + 2 * ((config["win_length"] - config["hop_length"]) // 2)) \
        // config["hop_length"]
    assert out.shape == (B, config["n_mels"], expected_frames), out.shape
    assert bool(jnp.all(jnp.isfinite(out)))
    print("KERNEL_OK")
</pallas_src>

<mosaic_0001>
module attributes {stable_mosaic.version = 11 : i64} {
  func.func @melspec_kernel(%arg0: i32, %arg1: memref<40x256xbf16, #tpu.memory_space<vmem>>, %arg2: memref<256x512xbf16, #tpu.memory_space<vmem>>, %arg3: memref<512x128xf32, #tpu.memory_space<vmem>>, %arg4: memref<40x128xf32, #tpu.memory_space<vmem>>) attributes {dimension_semantics = [#tpu.dimension_semantics<parallel>], iteration_bounds = array<i64: 1>, scalar_prefetch = 0 : i64, scratch_operands = 0 : i64, tpu.core_type = #tpu.core_type<tc>, window_params = [{transform_indices = @transform_0, window_bounds = array<i64: 40, 256>}, {pipeline_mode = #tpu.pipeline_mode<synchronous>, transform_indices = @transform_1, window_bounds = array<i64: 256, 512>}, {pipeline_mode = #tpu.pipeline_mode<synchronous>, transform_indices = @transform_2, window_bounds = array<i64: 512, 128>}, {transform_indices = @transform_3, window_bounds = array<i64: 40, 128>}]} {
    %c0 = arith.constant 0 : index
    %c0_0 = arith.constant 0 : index
    %0 = vector.load %arg1[%c0, %c0_0] : memref<40x256xbf16, #tpu.memory_space<vmem>>, vector<40x256xbf16>
    %c0_1 = arith.constant 0 : index
    %c0_2 = arith.constant 0 : index
    %1 = vector.load %arg2[%c0_1, %c0_2] : memref<256x512xbf16, #tpu.memory_space<vmem>>, vector<256x512xbf16>
    %cst = arith.constant dense<0.000000e+00> : vector<40x512xf32>
    %2 = tpu.matmul %0, %1, %cst {dimension_numbers = #tpu.dot_dimension_numbers<[1], [0], [0], [1], [0, 0, 1, 1], [], []>} : vector<40x256xbf16>, vector<256x512xbf16>, vector<40x512xf32> -> vector<40x512xf32>
    %3 = arith.mulf %2, %2 : vector<40x512xf32>
    %c0_3 = arith.constant 0 : index
    %c0_4 = arith.constant 0 : index
    %4 = vector.load %arg3[%c0_3, %c0_4] : memref<512x128xf32, #tpu.memory_space<vmem>>, vector<512x128xf32>
    %cst_5 = arith.constant dense<0.000000e+00> : vector<40x128xf32>
    %5 = tpu.matmul %3, %4, %cst_5 {dimension_numbers = #tpu.dot_dimension_numbers<[1], [0], [0], [1], [0, 0, 1, 1], [], []>} : vector<40x512xf32>, vector<512x128xf32>, vector<40x128xf32> -> vector<40x128xf32>
    %cst_6 = arith.constant 9.99999974E-6 : f32
    %6 = vector.broadcast %cst_6 : f32 to vector<40x128xf32>
    %7 = arith.maximumf %5, %6 : vector<40x128xf32>
    %8 = math.log %7 : vector<40x128xf32>
    %c0_7 = arith.constant 0 : index
    %c0_8 = arith.constant 0 : index
    %9 = vector.load %arg4[%c0_7, %c0_8] : memref<40x128xf32, #tpu.memory_space<vmem>>, vector<40x128xf32>
    tpu.vector_store %arg4[%c0_7, %c0_8], %8 {strides = array<i32>} : memref<40x128xf32, #tpu.memory_space<vmem>>, vector<40x128xf32>,
    return
  }
  func.func @transform_0(%arg0: i32) -> (i32, i32) {
    %c0_i32 = arith.constant 0 : i32
    %c0_i32_0 = arith.constant 0 : i32
    return %arg0, %c0_i32 : i32, i32
  }
  func.func @transform_1(%arg0: i32) -> (i32, i32) {
    %c0_i32 = arith.constant 0 : i32
    %c0_i32_0 = arith.constant 0 : i32
    %c0_i32_1 = arith.constant 0 : i32
    return %c0_i32, %c0_i32_0 : i32, i32
  }
  func.func @transform_2(%arg0: i32) -> (i32, i32) {
    %c0_i32 = arith.constant 0 : i32
    %c0_i32_0 = arith.constant 0 : i32
    %c0_i32_1 = arith.constant 0 : i32
    return %c0_i32, %c0_i32_0 : i32, i32
  }
  func.func @transform_3(%arg0: i32) -> (i32, i32) {
    %c0_i32 = arith.constant 0 : i32
    %c0_i32_0 = arith.constant 0 : i32
    return %arg0, %c0_i32 : i32, i32
  }
}

</mosaic_0001>

<bundles_post_ra>
// kernel: tpu_custom_call.1
= control target key start
LH: loop header
LB: loop body
LE: loop exit
PB: predicated region body
PF: predicated region fallthrough
CT: control target
= control target key end

     0   :  { %8 = vsyncpa [#allocation3], 0  ;;  %s1425_s0 = inlined_call_operand.hbm [shape: bf16[40,256], index: 0, kind: input, shape index: {}]   ;;  %s1426_s1 = inlined_call_operand.hbm [shape: bf16[256,512], index: 1, kind: input, shape index: {}]   ;;  %s1427_s2 = inlined_call_operand.hbm [shape: f32[512,128], index: 2, kind: input, shape index: {}]   ;;  %s1428_s3 = inlined_call_operand.hbm [shape: f32[40,128], index: 3, kind: output, shape index: {}]  }
   0x1   :  { %9 = vsyncpa [#allocation6], 0 }
   0x2   :  { %10 = vsyncpa [#allocation4], 0  ;;  %s1340_s12 = smov [#allocation5]   ;;  %s1246_s16 = scalar_lea.hbm %s1426_s1, 8192 }
   0x3   :  { %s28_s13 = sshll.u32 %s1340_s12, 4  ;;  %p1247_p0 = scmp.ne.s32.totalorder %s1426_s1, %s1246_s16  ;;  %s29_s13 = int_to_ptr.vmem [resolvable:$true] %s28_s13 }
   0x4   :  { %p1250_p1 = scmp.lt.u32.totalorder %s1246_s16, %s1426_s1 }
   0x6   :  { %p1252_p2 = pnand %p1250_p1, %p1247_p0 }
   0x8   :  { %1255 = shalt.err (!%p1252_p2)
}
   0x9   :  { %s1256_s21 = scalar_lea.vmem %s29_s13, 8192  ;;  %p1261_p4 = scmp.lt.s32.totalorder %s29_s13, %s29_s13 }
   0xa   :  { %p1257_p3 = scmp.ne.s32.totalorder %s29_s13, %s1256_s21  ;;  %p1262_p5 = scmp.lt.s32.totalorder %s1256_s21, %s1256_s21 }
   0xc   :  { %p1263_p6 = por %p1262_p5, %p1261_p4 }
   0xe   :  { %p1264_p7 = pnand %p1263_p6, %p1257_p3 }
  0x10   :  { %1267 = shalt.err (!%p1264_p7)
}
  0x11   :  { %s1341_s22 = smov 256   ;;  %s1342_s23 = smov 16  }
  0x12   :  { %34 = dma.hbm_to_vmem [thread:$0]  %s1426_s1, 8192, %s29_s13, [#allocation6], %s1341_s22, %s1341_s22, %s1342_s23  }
  0x13   :  { %s1343_s26 = smov [#allocation2]   ;;  %s1268_s30 = scalar_lea.hbm %s1425_s0, 640 }
  0x14   :  { %s16_s27 = sshll.u32 %s1343_s26, 4  ;;  %p1269_p8 = scmp.ne.s32.totalorder %s1425_s0, %s1268_s30  ;;  %s17_s27 = int_to_ptr.vmem [resolvable:$true] %s16_s27 }
  0x15   :  { %p1272_p9 = scmp.lt.u32.totalorder %s1268_s30, %s1425_s0 }
  0x17   :  { %p1274_p10 = pnand %p1272_p9, %p1269_p8 }
  0x19   :  { %1277 = shalt.err (!%p1274_p10)
}
  0x1a   :  { %s1278_s8 = scalar_lea.vmem %s17_s27, 640  ;;  %p1283_p12 = scmp.lt.s32.totalorder %s17_s27, %s17_s27 }
  0x1b   :  { %p1279_p11 = scmp.ne.s32.totalorder %s17_s27, %s1278_s8  ;;  %p1284_p13 = scmp.lt.s32.totalorder %s1278_s8, %s1278_s8 }
  0x1d   :  { %p1285_p0 = por %p1284_p13, %p1283_p12 }
  0x1f   :  { %p1286_p1 = pnand %p1285_p0, %p1279_p11 }
  0x21   :  { %1289 = shalt.err (!%p1286_p1)
}
  0x22   :  { %s1344_s1 = smov 128   ;;  %s1345_s9 = smov 8  }
  0x23   :  { %22 = dma.hbm_to_vmem [thread:$0]  %s1425_s0, 640, %s17_s27, [#allocation3], %s1344_s1, %s1344_s1, %s1345_s9  }
  0x24   :  { %s1346_s12 = smov [#allocation7]   ;;  %s1290_s16 = scalar_lea.hbm %s1427_s2, 8192 }
  0x25   :  { %s40_s13 = sshll.u32 %s1346_s12, 4  ;;  %p1291_p2 = scmp.ne.s32.totalorder %s1427_s2, %s1290_s16  ;;  %s41_s13 = int_to_ptr.vmem [resolvable:$true] %s40_s13 }
  0x26   :  { %p1294_p3 = scmp.lt.u32.totalorder %s1290_s16, %s1427_s2 }
  0x28   :  { %p1296_p4 = pnand %p1294_p3, %p1291_p2 }
  0x2a   :  { %1299 = shalt.err (!%p1296_p4)
}
  0x2b   :  { %s1300_s21 = scalar_lea.vmem %s41_s13, 8192  ;;  %p1305_p6 = scmp.lt.s32.totalorder %s41_s13, %s41_s13 }
  0x2c   :  { %p1301_p5 = scmp.ne.s32.totalorder %s41_s13, %s1300_s21  ;;  %p1306_p7 = scmp.lt.s32.totalorder %s1300_s21, %s1300_s21 }
  0x2e   :  { %p1307_p8 = por %p1306_p7, %p1305_p6 }
  0x30   :  { %p1308_p9 = pnand %p1307_p8, %p1301_p5 }
  0x32   :  { %1311 = shalt.err (!%p1308_p9)
}
  0x33   :  { %46 = dma.hbm_to_vmem [thread:$0]  %s1427_s2, 8192, %s41_s13, [#allocation6], %s1344_s1, %s1344_s1, %s1345_s9  }
  0x34   :  { %1334 = dma.done.wait [#allocation3], 640  }
  0x35   :  { %1335 = vsyncadd [#allocation3], 4294966656 }
  0x36   :  { %1336 = dma.done.wait [#allocation6], 16384  }
  0x37   :  { %1337 = vsyncadd [#allocation6], 4294950912  ;;  %v1132_v0 = vld [vmem:[#allocation5 + $0x4] ss:$16 sps:$4 sm:$0xff]   ;;  %v1134_v1 = vld [vmem:[#allocation5 + $0xc] ss:$16 sps:$4 sm:$0xff]  }
  0x38   :  { %472 = vmatprep.subr.bf16.mxu0 %v1132_v0  ;;  %v1136_v2 = vld [vmem:[#allocation5] ss:$16 sps:$4 sm:$0xff]   ;;  %v1137_v3 = vld [vmem:[#allocation5 + $0x8] ss:$16 sps:$4 sm:$0xff]   ;;  %533 = vmatprep.subr.bf16.mxu1 %v1134_v1  ;;  %v1138_v4 = vld [vmem:[#allocation5 + $0x24] ss:$16 sps:$4 sm:$0xff]  }
  0x39   :  { %473 = vmatpush1.bf16.msra.mxu0 %v1136_v2  ;;  %534 = vmatpush1.bf16.msra.mxu1 %v1137_v3  ;;  %v1140_v5 = vld [vmem:[#allocation5 + $0x2c] ss:$16 sps:$4 sm:$0xff]   ;;  %v1142_v6 = vld [vmem:[#allocation5 + $0x20] ss:$16 sps:$4 sm:$0xff]   ;;  %v1143_v7 = vld [vmem:[#allocation5 + $0x28] ss:$16 sps:$4 sm:$0xff]  }
  0x3a   :  { %474 = vmatprep.subr.bf16.mxu0 %v1138_v4  ;;  %535 = vmatprep.subr.bf16.mxu1 %v1140_v5  ;;  %v1144_v8 = vld [vmem:[#allocation5 + $0x44] ss:$16 sps:$4 sm:$0xff]   ;;  %v1146_v9 = vld [vmem:[#allocation5 + $0x4c] ss:$16 sps:$4 sm:$0xff]   ;;  %v1148_v10 = vld [vmem:[#allocation5 + $0x40] ss:$16 sps:$4 sm:$0xff]  }
  0x3b   :  { %v1149_v11 = vld [vmem:[#allocation5 + $0x48] ss:$16 sps:$4 sm:$0xff]   ;;  %v1150_v12 = vld [vmem:[#allocation5 + $0x64] ss:$16 sps:$4 sm:$0xff]   ;;  %v1152_v13 = vld [vmem:[#allocation5 + $0x6c] ss:$16 sps:$4 sm:$0xff]  }
  0x3c   :  { %v1154_v14 = vld [vmem:[#allocation5 + $0x60] ss:$16 sps:$4 sm:$0xff]   ;;  %v1155_v15 = vld [vmem:[#allocation5 + $0x68] ss:$16 sps:$4 sm:$0xff]   ;;  %v1156_v16 = vld [vmem:[#allocation5 + $0x84] ss:$16 sps:$4 sm:$0xff]  }
  0x3d   :  { %475 = vmatpush1.bf16.msra.mxu0 %v1142_v6  ;;  %536 = vmatpush1.bf16.msra.mxu1 %v1143_v7  ;;  %v1158_v17 = vld [vmem:[#allocation5 + $0x8c] ss:$16 sps:$4 sm:$0xff]   ;;  %v1160_v18 = vld [vmem:[#allocation5 + $0x80] ss:$16 sps:$4 sm:$0xff]   ;;  %v1161_v19 = vld [vmem:[#allocation5 + $0x88] ss:$16 sps:$4 sm:$0xff]  }
  0x3e   :  { %476 = vmatprep.subr.bf16.mxu0 %v1144_v8  ;;  %537 = vmatprep.subr.bf16.mxu1 %v1146_v9  ;;  %v1162_v20 = vld [vmem:[#allocation5 + $0xa4] ss:$16 sps:$4 sm:$0xff]   ;;  %v1164_v21 = vld [vmem:[#allocation5 + $0xac] ss:$16 sps:$4 sm:$0xff]   ;;  %v1166_v22 = vld [vmem:[#allocation5 + $0xa0] ss:$16 sps:$4 sm:$0xff]  }
  0x3f   :  { %v1167_v23 = vld [vmem:[#allocation5 + $0xa8] ss:$16 sps:$4 sm:$0xff]   ;;  %v1168_v24 = vld [vmem:[#allocation5 + $0xc4] ss:$16 sps:$4 sm:$0xff]   ;;  %v1170_v25 = vld [vmem:[#allocation5 + $0xcc] ss:$16 sps:$4 sm:$0xff]  }
  0x40   :  { %v1172_v26 = vld [vmem:[#allocation5 + $0xc0] ss:$16 sps:$4 sm:$0xff]   ;;  %v1173_v27 = vld [vmem:[#allocation5 + $0xc8] ss:$16 sps:$4 sm:$0xff]   ;;  %v1174_v28 = vld [vmem:[#allocation5 + $0xe4] ss:$16 sps:$4 sm:$0xff]  }
  0x41   :  { %477 = vmatpush1.bf16.msra.mxu0 %v1148_v10  ;;  %538 = vmatpush1.bf16.msra.mxu1 %v1149_v11  ;;  %v1176_v29 = vld [vmem:[#allocation5 + $0xec] ss:$16 sps:$4 sm:$0xff]   ;;  %v1178_v30 = vld [vmem:[#allocation5 + $0xe0] ss:$16 sps:$4 sm:$0xff]   ;;  %v1179_v31 = vld [vmem:[#allocation5 + $0xe8] ss:$16 sps:$4 sm:$0xff]  }
  0x42   :  { %478 = vmatprep.subr.bf16.mxu0 %v1150_v12  ;;  %539 = vmatprep.subr.bf16.mxu1 %v1152_v13  ;;  %v1180_v32 = vld [vmem:[#allocation5 + $0x104] ss:$16 sps:$4 sm:$0xff]   ;;  %v1182_v33 = vld [vmem:[#allocation5 + $0x10c] ss:$16 sps:$4 sm:$0xff]   ;;  %v1184_v34 = vld [vmem:[#allocation5 + $0x100] ss:$16 sps:$4 sm:$0xff]  }
  0x43   :  { %v1185_v35 = vld [vmem:[#allocation5 + $0x108] ss:$16 sps:$4 sm:$0xff]   ;;  %v1186_v36 = vld [vmem:[#allocation5 + $0x124] ss:$16 sps:$4 sm:$0xff]   ;;  %v1188_v37 = vld [vmem:[#allocation5 + $0x12c] ss:$16 sps:$4 sm:$0xff]  }
  0x44   :  { %v1190_v38 = vld [vmem:[#allocation5 + $0x120] ss:$16 sps:$4 sm:$0xff]   ;;  %v1191_v39 = vld [vmem:[#allocation5 + $0x128] ss:$16 sps:$4 sm:$0xff]   ;;  %v1192_v40 = vld [vmem:[#allocation5 + $0x144] ss:$16 sps:$4 sm:$0xff]  }
  0x45   :  { %479 = vmatpush1.bf16.msra.mxu0 %v1154_v14  ;;  %540 = vmatpush1.bf16.msra.mxu1 %v1155_v15  ;;  %v1194_v41 = vld [vmem:[#allocation5 + $0x14c] ss:$16 sps:$4 sm:$0xff]   ;;  %v1196_v42 = vld [vmem:[#allocation5 + $0x140] ss:$16 sps:$4 sm:$0xff]   ;;  %v1197_v43 = vld [vmem:[#allocation5 + $0x148] ss:$16 sps:$4 sm:$0xff]  }
  0x46   :  { %480 = vmatprep.subr.bf16.mxu0 %v1156_v16  ;;  %541 = vmatprep.subr.bf16.mxu1 %v1158_v17  ;;  %v1198_v44 = vld [vmem:[#allocation5 + $0x164] ss:$16 sps:$4 sm:$0xff]   ;;  %v1200_v45 = vld [vmem:[#allocation5 + $0x16c] ss:$16 sps:$4 sm:$0xff]   ;;  %v1202_v46 = vld [vmem:[#allocation5 + $0x160] ss:$16 sps:$4 sm:$0xff]  }
  0x47   :  { %v1230_v47 = vld [vmem:[#allocation2 + $0x4] ss:$8 sps:$4 sm:$0xff]   ;;  %v1203_v48 = vld [vmem:[#allocation5 + $0x168] ss:$16 sps:$4 sm:$0xff]   ;;  %v1208_v51 = vld [vmem:[#allocation5 + $0x180] ss:$16 sps:$4 sm:$0xff]  }
  0x48   :  { %v1204_v49 = vld [vmem:[#allocation5 + $0x184] ss:$16 sps:$4 sm:$0xff]   ;;  %v1206_v50 = vld [vmem:[#allocation5 + $0x18c] ss:$16 sps:$4 sm:$0xff]   ;;  %504 = vmatprep.mubr.bf16.mxu0 %v1230_v47  ;;  %565 = vmatprep.mubr.bf16.mxu1 %v1230_v47  ;;  %v1209_v52 = vld [vmem:[#allocation5 + $0x188] ss:$16 sps:$4 sm:$0xff]  }
  0x49   :  { %481 = vmatpush1.bf16.msra.mxu0 %v1160_v18  ;;  %542 = vmatpush1.bf16.msra.mxu1 %v1161_v19  ;;  %v1210_v53 = vld [vmem:[#allocation5 + $0x1a4] ss:$16 sps:$4 sm:$0xff]   ;;  %v1212_v54 = vld [vmem:[#allocation5 + $0x1ac] ss:$16 sps:$4 sm:$0xff]   ;;  %v1214_v55 = vld [vmem:[#allocation5 + $0x1a0] ss:$16 sps:$4 sm:$0xff]  }
  0x4a   :  { %482 = vmatprep.subr.bf16.mxu0 %v1162_v20  ;;  %543 = vmatprep.subr.bf16.mxu1 %v1164_v21  ;;  %v1215_v56 = vld [vmem:[#allocation5 + $0x1a8] ss:$16 sps:$4 sm:$0xff]   ;;  %v1216_v57 = vld [vmem:[#allocation5 + $0x1c4] ss:$16 sps:$4 sm:$0xff]   ;;  %v1218_v58 = vld [vmem:[#allocation5 + $0x1cc] ss:$16 sps:$4 sm:$0xff]  }
  0x4b   :  { %v1220_v59 = vld [vmem:[#allocation5 + $0x1c0] ss:$16 sps:$4 sm:$0xff]   ;;  %v1221_v60 = vld [vmem:[#allocation5 + $0x1c8] ss:$16 sps:$4 sm:$0xff]   ;;  %v1222_v61 = vld [vmem:[#allocation5 + $0x1e4] ss:$16 sps:$4 sm:$0xff]  }
  0x4c   :  { %v1224_v62 = vld [vmem:[#allocation5 + $0x1ec] ss:$16 sps:$4 sm:$0xff]   ;;  %v630_v63 = vld [vmem:[#allocation7 + $0x80] sm:$0xff]  ;;  %v1227_v4 = vld [vmem:[#allocation5 + $0x1e8] ss:$16 sps:$4 sm:$0xff]   ;;  %s1347_s2 = smov [#allocation8]  }
  0x4d   :  { %483 = vmatpush1.bf16.msra.mxu0 %v1166_v22  ;;  %544 = vmatpush1.bf16.msra.mxu1 %v1167_v23  ;;  %v631_v0 = vld [vmem:[#allocation7 + $0x88] sm:$0xff]  ;;  %v662_v1 = vld [vmem:[#allocation7 + $0x180] sm:$0xff]  ;;  %v632_v12 = vld [vmem:[#allocation7 + $0x90] sm:$0xff]  ;;  %s883_s23 = sshll.u32 %s1347_s2, 4  ;;  %s884_s23 = int_to_ptr.vmem [resolvable:$true] %s883_s23 }
  0x4e   :  { %484 = vmatprep.subr.bf16.mxu0 %v1168_v24  ;;  %545 = vmatprep.subr.bf16.mxu1 %v1170_v25  ;;  %v663_v2 = vld [vmem:[#allocation7 + $0x188] sm:$0xff]  ;;  %v1226_v3 = vld [vmem:[#allocation5 + $0x1e0] ss:$16 sps:$4 sm:$0xff]   ;;  %v1060_v6 = vpack.c.bf16 %v631_v0, %v630_v63  ;;  %v633_v13 = vld [vmem:[#allocation7 + $0x98] sm:$0xff]  ;;  %s1312_s24 = scalar_lea.vmem %s884_s23, 640  ;;  %p1317_p11 = scmp.lt.s32.totalorder %s884_s23, %s884_s23 }
  0x4f   :  { %v1228_v5 = vld [vmem:[#allocation2] ss:$8 sps:$4 sm:$0xff]   ;;  %v1092_v7 = vpack.c.bf16 %v663_v2, %v662_v1  ;;  %v615_v9 = vld [vmem:[#allocation7 + $0x8] sm:$0xff]  ;;  %v664_v14 = vld [vmem:[#allocation7 + $0x190] sm:$0xff]  ;;  %v1064_v21 = vpack.c.bf16 %v633_v13, %v632_v12  ;;  %p1313_p10 = scmp.ne.s32.totalorder %s884_s23, %s1312_s24  ;;  %p1318_p12 = scmp.lt.s32.totalorder %s1312_s24, %s1312_s24 }
  0x50   :  { %v614_v8 = vld [vmem:[#allocation7] sm:$0xff]  ;;  %v647_v11 = vld [vmem:[#allocation7 + $0x108] sm:$0xff]  ;;  %v665_v15 = vld [vmem:[#allocation7 + $0x198] sm:$0xff] }
  0x51   :  { %485 = vmatpush1.bf16.msra.mxu0 %v1172_v26  ;;  %546 = vmatpush1.bf16.msra.mxu1 %v1173_v27  ;;  %v646_v10 = vld [vmem:[#allocation7 + $0x100] sm:$0xff]  ;;  %v1231_v16 = vld [vmem:[#allocation2 + $0x14] ss:$8 sps:$4 sm:$0xff]   ;;  %v1062_v17 = vpack.c.bf16 %v615_v9, %v614_v8  ;;  %v617_v20 = vld [vmem:[#allocation7 + $0x18] sm:$0xff]  ;;  %v1096_v22 = vpack.c.bf16 %v665_v15, %v664_v14  ;;  %p1319_p13 = por %p1318_p12, %p1317_p11 }
  0x52   :  { %486 = vmatprep.subr.bf16.mxu0 %v1174_v28  ;;  %547 = vmatprep.subr.bf16.mxu1 %v1176_v29  ;;  %v1094_v18 = vpack.c.bf16 %v647_v11, %v646_v10  ;;  %v616_v19 = vld [vmem:[#allocation7 + $0x10] sm:$0xff]  ;;  %v649_v24 = vld [vmem:[#allocation7 + $0x118] sm:$0xff]  ;;  %v634_v25 = vld [vmem:[#allocation7 + $0xa0] sm:$0xff] }
  0x53   :  { %v648_v23 = vld [vmem:[#allocation7 + $0x110] sm:$0xff]  ;;  %v635_v26 = vld [vmem:[#allocation7 + $0xa8] sm:$0xff]  ;;  %v666_v27 = vld [vmem:[#allocation7 + $0x1a0] sm:$0xff]  ;;  %p1320_p0 = pnand %p1319_p13, %p1313_p10 }
  0x54   :  { %v667_v28 = vld [vmem:[#allocation7 + $0x1a8] sm:$0xff]  ;;  %v621_v47 = vld [vmem:[#allocation7 + $0x38] sm:$0xff]  ;;  %v640_v0 = vld [vmem:[#allocation7 + $0xd0] sm:$0xff] }
  0x55   :  { %487 = vmatpush1.bf16.msra.mxu0 %v1178_v30  ;;  %548 = vmatpush1.bf16.msra.mxu1 %v1179_v31  ;;  %v1233_v29 = vld [vmem:[#allocation2 + $0x10] ss:$8 sps:$4 sm:$0xff]   ;;  %v60_v30 = vld [vmem:[#allocation2 + $0x20] sm:$0xff]  ;;  %v1066_v31 = vpack.c.bf16 %v617_v20, %v616_v19  ;;  %v642_v13 = vld [vmem:[#allocation7 + $0xe0] sm:$0xff] }
  0x56   :  { %488 = vmatprep.subr.bf16.mxu0 %v1180_v32  ;;  %549 = vmatprep.subr.bf16.mxu1 %v1182_v33  ;;  %v1098_v32 = vpack.c.bf16 %v649_v24, %v648_v23  ;;  %v618_v33 = vld [vmem:[#allocation7 + $0x20] sm:$0xff]  ;;  %v655_v63 = vld [vmem:[#allocation7 + $0x148] sm:$0xff]  ;;  %v900_v1 = vcombine.low %v60_v30, %v60_v30  ;;  %v641_v2 = vld [vmem:[#allocation7 + $0xd8] sm:$0xff] }
  0x57   :  { %v625_v8 = vld [vmem:[#allocation7 + $0x58] sm:$0xff]  ;;  %v1080_v9 = vpack.c.bf16 %v641_v2, %v640_v0  ;;  %v656_v11 = vld [vmem:[#allocation7 + $0x150] sm:$0xff]  ;;  %v643_v14 = vld [vmem:[#allocation7 + $0xe8] sm:$0xff] }
  0x58   :  { %v657_v12 = vld [vmem:[#allocation7 + $0x158] sm:$0xff]  ;;  %v674_v15 = vld [vmem:[#allocation7 + $0x1e0] sm:$0xff]  ;;  %v1084_v20 = vpack.c.bf16 %v643_v14, %v642_v13  ;;  %v659_v24 = vld [vmem:[#allocation7 + $0x168] sm:$0xff] }
  0x59   :  { %489 = vmatpush1.bf16.msra.mxu0 %v1184_v34  ;;  %550 = vmatpush1.bf16.msra.mxu1 %v1185_v35  ;;  %v619_v34 = vld [vmem:[#allocation7 + $0x28] sm:$0xff]  ;;  %v1068_v35 = vpack.c.bf16 %v635_v26, %v634_v25  ;;  %v626_v19 = vld [vmem:[#allocation7 + $0x60] sm:$0xff] }
  0x5a   :  { %490 = vmatprep.subr.bf16.mxu0 %v1186_v36  ;;  %551 = vmatprep.subr.bf16.mxu1 %v1188_v37  ;;  %v1100_v36 = vpack.c.bf16 %v667_v28, %v666_v27  ;;  %v650_v37 = vld [vmem:[#allocation7 + $0x120] sm:$0xff]  ;;  %v644_v27 = vld [vmem:[#allocation7 + $0xf0] sm:$0xff]  ;;  %v645_v28 = vld [vmem:[#allocation7 + $0xf8] sm:$0xff] }
  0x5b   :  { %v658_v23 = vld [vmem:[#allocation7 + $0x160] sm:$0xff] }
  0x5c   :  { %v1118_v26 = vpack.c.bf16 %v659_v24, %v658_v23 }
  0x5d   :  { %491 = vmatpush1.bf16.msra.mxu0 %v1190_v38  ;;  %552 = vmatpush1.bf16.msra.mxu1 %v1191_v39  ;;  %v651_v38 = vld [vmem:[#allocation7 + $0x128] sm:$0xff]  ;;  %v636_v39 = vld [vmem:[#allocation7 + $0xb0] sm:$0xff] }
  0x5e   :  { %492 = vmatprep.subr.bf16.mxu0 %v1192_v40  ;;  %553 = vmatprep.subr.bf16.mxu1 %v1194_v41  ;;  %v637_v40 = vld [vmem:[#allocation7 + $0xb8] sm:$0xff]  ;;  %v668_v41 = vld [vmem:[#allocation7 + $0x1b0] sm:$0xff] }
  0x61   :  { %493 = vmatpush1.bf16.msra.mxu0 %v1196_v42  ;;  %554 = vmatpush1.bf16.msra.mxu1 %v1197_v43  ;;  %v669_v42 = vld [vmem:[#allocation7 + $0x1b8] sm:$0xff]  ;;  %v901_v43 = vcombine.high %v60_v30, %v60_v30  ;;  %v1088_v30 = vpack.c.bf16 %v645_v28, %v644_v27 }
  0x62   :  { %494 = vmatprep.subr.bf16.mxu0 %v1198_v44  ;;  %555 = vmatprep.subr.bf16.mxu1 %v1200_v45  ;;  %v1070_v44 = vpack.c.bf16 %v619_v34, %v618_v33  ;;  %v1102_v45 = vpack.c.bf16 %v651_v38, %v650_v37  ;;  %v629_v33 = vld [vmem:[#allocation7 + $0x78] sm:$0xff] }
  0x63   :  { %v661_v37 = vld [vmem:[#allocation7 + $0x178] sm:$0xff] }
  0x65   :  { %495 = vmatpush1.bf16.msra.mxu0 %v1202_v46  ;;  %556 = vmatpush1.bf16.msra.mxu1 %v1203_v48  ;;  %v620_v46 = vld [vmem:[#allocation7 + $0x30] sm:$0xff]  ;;  %v1072_v48 = vpack.c.bf16 %v637_v40, %v636_v39 }
  0x66   :  { %496 = vmatprep.subr.bf16.mxu0 %v1204_v49  ;;  %557 = vmatprep.subr.bf16.mxu1 %v1206_v50  ;;  %v1104_v49 = vpack.c.bf16 %v669_v42, %v668_v41  ;;  %v652_v50 = vld [vmem:[#allocation7 + $0x130] sm:$0xff] }
  0x69   :  { %497 = vmatpush1.bf16.msra.mxu0 %v1208_v51  ;;  %558 = vmatpush1.bf16.msra.mxu1 %v1209_v52  ;;  %v653_v51 = vld [vmem:[#allocation7 + $0x138] sm:$0xff]  ;;  %v638_v52 = vld [vmem:[#allocation7 + $0xc0] sm:$0xff] }
  0x6a   :  { %498 = vmatprep.subr.bf16.mxu0 %v1210_v53  ;;  %559 = vmatprep.subr.bf16.mxu1 %v1212_v54  ;;  %v639_v53 = vld [vmem:[#allocation7 + $0xc8] sm:$0xff]  ;;  %v670_v54 = vld [vmem:[#allocation7 + $0x1c0] sm:$0xff] }
  0x6d   :  { %499 = vmatpush1.bf16.msra.mxu0 %v1214_v55  ;;  %560 = vmatpush1.bf16.msra.mxu1 %v1215_v56  ;;  %v671_v55 = vld [vmem:[#allocation7 + $0x1c8] sm:$0xff]  ;;  %v1074_v56 = vpack.c.bf16 %v621_v47, %v620_v46 }
  0x6e   :  { %500 = vmatprep.subr.bf16.mxu0 %v1216_v57  ;;  %561 = vmatprep.subr.bf16.mxu1 %v1218_v58  ;;  %v1106_v57 = vpack.c.bf16 %v653_v51, %v652_v50  ;;  %v622_v58 = vld [vmem:[#allocation7 + $0x40] sm:$0xff] }
  0x71   :  { %501 = vmatpush1.bf16.msra.mxu0 %v1220_v59  ;;  %562 = vmatpush1.bf16.msra.mxu1 %v1221_v60  ;;  %v623_v59 = vld [vmem:[#allocation7 + $0x48] sm:$0xff]  ;;  %v1076_v60 = vpack.c.bf16 %v639_v53, %v638_v52 }
  0x72   :  { %502 = vmatprep.subr.bf16.mxu0 %v1222_v61  ;;  %563 = vmatprep.subr.bf16.mxu1 %v1224_v62  ;;  %v1108_v61 = vpack.c.bf16 %v671_v55, %v670_v54  ;;  %v654_v62 = vld [vmem:[#allocation7 + $0x140] sm:$0xff] }
  0x75   :  { %503 = vmatpush1.bf16.msra.mxu0 %v1226_v3  ;;  %564 = vmatpush1.bf16.msra.mxu1 %v1227_v4  ;;  %v672_v3 = vld [vmem:[#allocation7 + $0x1d0] sm:$0xff]  ;;  %v673_v4 = vld [vmem:[#allocation7 + $0x1d8] sm:$0xff] }
  0x76   :  { %1061 = vmatprep.subr.bf16.mxu0 %v1060_v6  ;;  %1093 = vmatprep.subr.bf16.mxu1 %v1092_v7  ;;  %v1110_v6 = vpack.c.bf16 %v655_v63, %v654_v62  ;;  %v624_v7 = vld [vmem:[#allocation7 + $0x50] sm:$0xff]  ;;  %v1112_v10 = vpack.c.bf16 %v673_v4, %v672_v3 }
  0x78   :  { %505 = vmatmul.mubr.bf16.vlgmr.msra.gmra.mrb[0].mxu0 %v1228_v5  ;;  %566 = vmatmul.mubr.bf16.vlgmr.msra.gmra.mrb[0].mxu1 %v1228_v5  ;;  %v1078_v5 = vpack.c.bf16 %v623_v59, %v622_v58 }
  0x79   :  { %514 = vmatprep.mubr.bf16.mxu0 %v1231_v16  ;;  %575 = vmatprep.mubr.bf16.mxu1 %v1231_v16  ;;  %v675_v16 = vld [vmem:[#allocation7 + $0x1e8] sm:$0xff] }
  0x7a   :  { %1063 = vmatpush3.bf16.msra.mxu0 %v1062_v17  ;;  %1095 = vmatpush3.bf16.msra.mxu1 %v1094_v18  ;;  %v1082_v17 = vpack.c.bf16 %v625_v8, %v624_v7  ;;  %v1114_v18 = vpack.c.bf16 %v657_v12, %v656_v11 }
  0x7b   :  { %1065 = vmatprep.subr.bf16.mxu0 %v1064_v21  ;;  %1097 = vmatprep.subr.bf16.mxu1 %v1096_v22  ;;  %v1116_v21 = vpack.c.bf16 %v675_v16, %v674_v15  ;;  %v627_v22 = vld [vmem:[#allocation7 + $0x68] sm:$0xff] }
  0x7c   :  { %v1086_v25 = vpack.c.bf16 %v627_v22, %v626_v19 }
  0x7e   :  { %1067 = vmatpush3.bf16.msra.mxu0 %v1066_v31  ;;  %1099 = vmatpush3.bf16.msra.mxu1 %v1098_v32  ;;  %v677_v31 = vld [vmem:[#allocation7 + $0x1f8] sm:$0xff]  ;;  %v628_v32 = vld [vmem:[#allocation7 + $0x70] sm:$0xff] }
  0x7f   :  { %1069 = vmatprep.subr.bf16.mxu0 %v1068_v35  ;;  %1101 = vmatprep.subr.bf16.mxu1 %v1100_v36  ;;  %v1090_v35 = vpack.c.bf16 %v629_v33, %v628_v32  ;;  %v660_v36 = vld [vmem:[#allocation7 + $0x170] sm:$0xff] }
  0x80   :  { %515 = vmatmul.mubr.bf16.gmra.mrb[4].mxu0 %v1233_v29  ;;  %576 = vmatmul.mubr.bf16.gmra.mrb[4].mxu1 %v1233_v29  ;;  %v676_v29 = vld [vmem:[#allocation7 + $0x1f0] sm:$0xff]  ;;  %v1122_v38 = vpack.c.bf16 %v661_v37, %v660_v36 }
  0x81   :  { %524 = vmatprep.mubr.bf16.mxu0 %v901_v43  ;;  %585 = vmatprep.mubr.bf16.mxu1 %v901_v43  ;;  %v1120_v34 = vpack.c.bf16 %v677_v31, %v676_v29 }
  0x82   :  { %1071 = vmatpush3.bf16.msra.mxu0 %v1070_v44  ;;  %1103 = vmatpush3.bf16.msra.mxu1 %v1102_v45 }
  0x83   :  { %1073 = vmatprep.subr.bf16.mxu0 %v1072_v48  ;;  %1105 = vmatprep.subr.bf16.mxu1 %v1104_v49 }
  0x86   :  { %1075 = vmatpush3.bf16.msra.mxu0 %v1074_v56  ;;  %1107 = vmatpush3.bf16.msra.mxu1 %v1106_v57 }
  0x87   :  { %1077 = vmatprep.subr.bf16.mxu0 %v1076_v60  ;;  %1109 = vmatprep.subr.bf16.mxu1 %v1108_v61 }
  0x88   :  { %525 = vmatmul.mubr.bf16.gmra.mrb[8].mxu0 %v900_v1  ;;  %586 = vmatmul.mubr.bf16.gmra.mrb[8].mxu1 %v900_v1 }
  0x8a   :  { %1079 = vmatpush3.bf16.msra.mxu0 %v1078_v5  ;;  %1111 = vmatpush3.bf16.msra.mxu1 %v1110_v6 }
  0x8b   :  { %1081 = vmatprep.subr.bf16.mxu0 %v1080_v9  ;;  %1113 = vmatprep.subr.bf16.mxu1 %v1112_v10 }
  0x8e   :  { %1083 = vmatpush3.bf16.msra.mxu0 %v1082_v17  ;;  %1115 = vmatpush3.bf16.msra.mxu1 %v1114_v18 }
  0x8f   :  { %1085 = vmatprep.subr.bf16.mxu0 %v1084_v20  ;;  %1117 = vmatprep.subr.bf16.mxu1 %v1116_v21 }
  0x92   :  { %1087 = vmatpush3.bf16.msra.mxu0 %v1086_v25  ;;  %1119 = vmatpush3.bf16.msra.mxu1 %v1118_v26 }
  0x93   :  { %1089 = vmatprep.subr.bf16.mxu0 %v1088_v30  ;;  %1121 = vmatprep.subr.bf16.mxu1 %v1120_v34 }
  0x96   :  { %1091 = vmatpush3.bf16.msra.mxu0 %v1090_v35  ;;  %1123 = vmatpush3.bf16.msra.mxu1 %v1122_v38 }
 0x14b   :  { %v506_v39 = vpop.f32.mrb[0].mxu0  ;;  %v567_v40 = vpop.f32.mrb[0].mxu1 }
 0x14c   :  { %v508_v41 = vpop.f32.mrb[1].mxu0  ;;  %v569_v42 = vpop.f32.mrb[1].mxu1  ;;  %v594_v47 = vmul.f32 %v506_v39, %v506_v39  ;;  %v596_v48 = vmul.f32 %v567_v40, %v567_v40 }
 0x14d   :  { %v595_v43 = vmul.f32 %v508_v41, %v508_v41  ;;  %v597_v44 = vmul.f32 %v569_v42, %v569_v42  ;;  %v510_v45 = vpop.f32.mrb[2].mxu0  ;;  %v571_v46 = vpop.f32.mrb[2].mxu1 }
 0x14e   :  { %v512_v49 = vpop.f32.mrb[3].mxu0  ;;  %v573_v50 = vpop.f32.mrb[3].mxu1  ;;  %v598_v53 = vmul.f32 %v510_v45, %v510_v45  ;;  %v600_v54 = vmul.f32 %v571_v46, %v571_v46 }
 0x14f   :  { %v599_v51 = vmul.f32 %v512_v49, %v512_v49  ;;  %v601_v52 = vmul.f32 %v573_v50, %v573_v50  ;;  %742 = vmatprep.mubr.f32.mxu0 %v595_v43  ;;  %832 = vmatprep.mubr.f32.mxu1 %v597_v44 }
 0x150   :  { %743 = vmatmul.mubr.f32.vlgmr.msra.gmra.mrb[12].mxu0 %v594_v47  ;;  %833 = vmatmul.mubr.f32.vlgmr.msra.gmra.mrb[12].mxu1 %v596_v48 }
 0x151   :  { %747 = vmatprep.mubr.f32.mxu0 %v599_v51  ;;  %837 = vmatprep.mubr.f32.mxu1 %v601_v52 }
 0x153   :  { %v516_v55 = vpop.f32.mrb[4].mxu0  ;;  %v577_v56 = vpop.f32.mrb[4].mxu1 }
 0x154   :  { %v518_v57 = vpop.f32.mrb[5].mxu0  ;;  %v579_v58 = vpop.f32.mrb[5].mxu1  ;;  %748 = vmatmul.mubr.f32.gmra.mrb[14].mxu0 %v598_v53  ;;  %838 = vmatmul.mubr.f32.gmra.mrb[14].mxu1 %v600_v54  ;;  %v602_v63 = vmul.f32 %v516_v55, %v516_v55  ;;  %v604_v0 = vmul.f32 %v577_v56, %v577_v56 }
 0x155   :  { %v603_v59 = vmul.f32 %v518_v57, %v518_v57  ;;  %v605_v60 = vmul.f32 %v579_v58, %v579_v58  ;;  %v520_v61 = vpop.f32.mrb[6].mxu0  ;;  %v581_v62 = vpop.f32.mrb[6].mxu1 }
 0x156   :  { %v522_v1 = vpop.f32.mrb[7].mxu0  ;;  %v583_v2 = vpop.f32.mrb[7].mxu1  ;;  %v606_v5 = vmul.f32 %v520_v61, %v520_v61  ;;  %v608_v6 = vmul.f32 %v581_v62, %v581_v62 }
 0x157   :  { %v607_v3 = vmul.f32 %v522_v1, %v522_v1  ;;  %v609_v4 = vmul.f32 %v583_v2, %v583_v2  ;;  %752 = vmatprep.mubr.f32.mxu0 %v603_v59  ;;  %842 = vmatprep.mubr.f32.mxu1 %v605_v60 }
 0x158   :  { %753 = vmatmul.mubr.f32.gmra.mrb[16].mxu0 %v602_v63  ;;  %843 = vmatmul.mubr.f32.gmra.mrb[16].mxu1 %v604_v0 }
 0x159   :  { %757 = vmatprep.mubr.f32.mxu0 %v607_v3  ;;  %847 = vmatprep.mubr.f32.mxu1 %v609_v4 }
 0x15b   :  { %v526_v7 = vpop.f32.mrb[8].mxu0  ;;  %v587_v8 = vpop.f32.mrb[8].mxu1 }
 0x15c   :  { %v528_v9 = vpop.f32.mrb[9].mxu0  ;;  %v589_v10 = vpop.f32.mrb[9].mxu1  ;;  %758 = vmatmul.mubr.f32.gmra.mrb[18].mxu0 %v606_v5  ;;  %848 = vmatmul.mubr.f32.gmra.mrb[18].mxu1 %v608_v6  ;;  %v610_v15 = vmul.f32 %v526_v7, %v526_v7  ;;  %v612_v16 = vmul.f32 %v587_v8, %v587_v8 }
 0x15d   :  { %v611_v11 = vmul.f32 %v528_v9, %v528_v9  ;;  %v613_v12 = vmul.f32 %v589_v10, %v589_v10  ;;  %v530_v13 = vpop.f32.mrb[10].mxu0  ;;  %v591_v14 = vpop.f32.mrb[10].mxu1 }
 0x15e   :  { %v531_v17 = vpop.f32.mrb[11].mxu0  ;;  %v592_v18 = vpop.f32.mrb[11].mxu1 }
 0x15f   :  { %762 = vmatprep.mubr.f32.mxu0 %v611_v11  ;;  %852 = vmatprep.mubr.f32.mxu1 %v613_v12 }
 0x160   :  { %763 = vmatmul.mubr.f32.gmra.mrb[20].mxu0 %v610_v15  ;;  %853 = vmatmul.mubr.f32.gmra.mrb[20].mxu1 %v612_v16 }
 0x223   :  { %v998_v19 = vpop.f32.mrb[12].mxu0  ;;  %v1045_v20 = vpop.f32.mrb[12].mxu1 }
 0x224   :  { %v999_v21 = vpop.f32.mrb[13].mxu0  ;;  %v1046_v22 = vpop.f32.mrb[13].mxu1 }
 0x225   :  { %v1000_v23 = vadd.f32 %v999_v21, %v998_v19  ;;  %v1047_v24 = vadd.f32 %v1046_v22, %v1045_v20 }
 0x227   :  { %v835_v25 = vadd.f32 %v1047_v24, %v1000_v23  ;;  %v1001_v26 = vpop.f32.mrb[14].mxu0  ;;  %v1048_v27 = vpop.f32.mrb[14].mxu1 }
 0x228   :  { %v1002_v28 = vpop.f32.mrb[15].mxu0  ;;  %v1049_v29 = vpop.f32.mrb[15].mxu1 }
 0x229   :  { %v858_v30 = vmax.f32 %v835_v25, 1e-05  ;;  %v1003_v31 = vadd.f32 %v1002_v28, %v1001_v26  ;;  %v1050_v32 = vadd.f32 %v1049_v29, %v1048_v27 }
 0x22b   :  { %1236 = vlog2.f32 %v858_v30  ;;  %v840_v33 = vadd.f32 %v1050_v32, %v1003_v31  ;;  %v1004_v34 = vpop.f32.mrb[16].mxu0  ;;  %v1051_v35 = vpop.f32.mrb[16].mxu1 }
 0x22c   :  { %v1005_v36 = vpop.f32.mrb[17].mxu0  ;;  %v1052_v37 = vpop.f32.mrb[17].mxu1 }
 0x22d   :  { %v859_v38 = vmax.f32 %v840_v33, 1e-05  ;;  %v1006_v39 = vadd.f32 %v1005_v36, %v1004_v34  ;;  %v1053_v40 = vadd.f32 %v1052_v37, %v1051_v35 }
 0x22f   :  { %1238 = vlog2.f32 %v859_v38  ;;  %v845_v41 = vadd.f32 %v1053_v40, %v1006_v39  ;;  %v1007_v42 = vpop.f32.mrb[18].mxu0  ;;  %v1054_v43 = vpop.f32.mrb[18].mxu1 }
 0x230   :  { %v1008_v44 = vpop.f32.mrb[19].mxu0  ;;  %v1055_v45 = vpop.f32.mrb[19].mxu1 }
 0x231   :  { %v860_v46 = vmax.f32 %v845_v41, 1e-05  ;;  %v1009_v47 = vadd.f32 %v1008_v44, %v1007_v42  ;;  %v1056_v48 = vadd.f32 %v1055_v45, %v1054_v43 }
 0x233   :  { %1240 = vlog2.f32 %v860_v46  ;;  %v850_v49 = vadd.f32 %v1056_v48, %v1009_v47  ;;  %v1010_v50 = vpop.f32.mrb[20].mxu0  ;;  %v1057_v51 = vpop.f32.mrb[20].mxu1 }
 0x234   :  { %v1011_v52 = vpop.f32.mrb[21].mxu0  ;;  %v1058_v53 = vpop.f32.mrb[21].mxu1 }
 0x235   :  { %v1237_v54 = vpop.eup %1236  ;;  %v861_v55 = vmax.f32 %v850_v49, 1e-05  ;;  %v1012_v56 = vadd.f32 %v1011_v52, %v1010_v50  ;;  %v1059_v57 = vadd.f32 %v1058_v53, %v1057_v51 }
 0x236   :  { %v864_v58 = vmul.f32 0.6931472, %v1237_v54 }
 0x237   :  { %1242 = vlog2.f32 %v861_v55  ;;  %v855_v59 = vadd.f32 %v1059_v57, %v1012_v56 }
 0x238   :  { %873 = vst [vmem:[#allocation8] sm:$0xff] %v864_v58 }
 0x239   :  { %v1239_v60 = vpop.eup %1238  ;;  %v862_v61 = vmax.f32 %v855_v59, 1e-05 }
 0x23a   :  { %v866_v62 = vmul.f32 0.6931472, %v1239_v60 }
 0x23b   :  { %1244 = vlog2.f32 %v862_v61 }
 0x23c   :  { %874 = vst [vmem:[#allocation8 + $0x8] sm:$0xff] %v866_v62 }
 0x23d   :  { %v1241_v63 = vpop.eup %1240 }
 0x23e   :  { %v868_v0 = vmul.f32 0.6931472, %v1241_v63 }
 0x240   :  { %875 = vst [vmem:[#allocation8 + $0x10] sm:$0xff] %v868_v0 }
 0x241   :  { %v1243_v1 = vpop.eup %1242 }
 0x242   :  { %v870_v2 = vmul.f32 0.6931472, %v1243_v1 }
 0x244   :  { %876 = vst [vmem:[#allocation8 + $0x18] sm:$0xff] %v870_v2 }
 0x245   :  { %v1245_v3 = vpop.eup %1244 }
 0x246   :  { %v872_v4 = vmul.f32 0.6931472, %v1245_v3 }
 0x248   :  { %877 = vst [vmem:[#allocation8 + $0x20] sm:$0xff] %v872_v4 }
 0x249   :  { %1323 = shalt.err (!%p1320_p0)
}
 0x24a   :  { %s1324_s27 = scalar_lea.hbm %s1428_s3, 640 }
 0x24b   :  { %p1325_p1 = scmp.ne.s32.totalorder %s1428_s3, %s1324_s27  ;;  %p1328_p2 = scmp.lt.u32.totalorder %s1324_s27, %s1428_s3 }
 0x24d   :  { %p1330_p3 = pnand %p1328_p2, %p1325_p1 }
 0x24f   :  { %1333 = shalt.err (!%p1330_p3)
}
 0x250   :  { %889 = dma.vmem_to_hbm [thread:$0]  %s884_s23, 640, %s1428_s3, [#allocation4], %s1344_s1, %s1344_s1, %s1345_s9  }
 0x251   :  { %1338 = dma.done.wait [#allocation4], 640  }
 0x252   :  { %1339 = vsyncadd [#allocation4], 4294966656 }
 0x253   :  { %893 = vsyncpa [#allocation3], 1 }
 0x254   :  { %894 = vsyncpa [#allocation6], 1 }
 0x255   :  { %895 = vsyncpa [#allocation4], 1 }

</bundles_post_ra>
